<compile_context>
chip_gen: v7x
topology: tpu7x:2x2x1
jax: 0.10.0
libtpu: 0.0.40
codegen_flags: <defaults>
</compile_context>

<pallas_src>
import math
import jax
import jax.numpy as jnp
from jax.experimental import pallas as pl
from jax.experimental.pallas import tpu as pltpu


def _round_up(a: int, b: int) -> int:
    return (a + b - 1) // b * b


def nan_embed_kernel(nan_ref, x_ref, m_ref, w_ref, sel_ref, b_ref, o_ref):
    # nan_ref: SMEM (1,)          f32 - learned NaN-replacement value
    # x_ref  : VMEM (tm, Din)         - input row tile
    # m_ref  : VMEM (tm, 1)           - mask column tile
    # w_ref  : VMEM (Din, 2*Dout)     - [W | 0]      (resident)
    # sel_ref: VMEM (1, 2*Dout)       - [0 | ones]   (resident)
    # b_ref  : VMEM (1, 2*Dout)       - [bias | 0]   (resident)
    # o_ref  : VMEM (tm, 2*Dout)      - [x@W + b | broadcast mask], single store
    x = x_ref[...]
    x = jnp.where(jnp.isnan(x), nan_ref[0], x)                      # x[isnan(x)] = nanVal

    out = jnp.dot(x, w_ref[...], preferred_element_type=jnp.float32)
    out = out + jnp.dot(m_ref[...], sel_ref[...],
                        preferred_element_type=jnp.float32)          # mask -> right half
    out = out + b_ref[...]                                           # bias (left half only)

    o_ref[...] = out.astype(o_ref.dtype)                             # one full-width store


def _choose_tiles(M: int, tm_max: int):
    """Return (tm, grid_m, M_pad).  Prefer M_pad == M (no wrapper pad/slice)."""
    if M <= tm_max:
        # Single full-size block (block shape == full array dims, so no (8,128)
        # divisibility requirement).  Split in two for the 2-TC chips when the
        # problem is big enough and splits cleanly.
        if M >= 4096 and M % 16 == 0:
            return M // 2, 2, M
        return M, 1, M
    # Largest tm (multiple of 8, <= tm_max) that divides M exactly; prefer an
    # even grid so v7x's two TensorCores get equal step counts.
    best = None
    tm = (tm_max // 8) * 8
    while tm >= 512:
        if M % tm == 0:
            g = M // tm
            if g % 2 == 0:
                return tm, g, M
            if best is None:
                best = (tm, g, M)
        tm -= 8
    if best is not None:
        return best
    # Rare fallback (no usable divisor): pad rows, trim after the call.
    tm = (tm_max // 8) * 8
    M_pad = _round_up(M, tm)
    return tm, M_pad // tm, M_pad


def nan_embed(x, mask, weight_t, bias, nan_val, *, tm_max=8192):
    """x: (B,S,Din), mask: (B,S,1), weight_t: (Din,Dout), bias: (Dout,), nan_val: (1,)."""
    B, S, Din = x.shape
    Dout = weight_t.shape[1]
    M = B * S

    tm, grid_m, M_pad = _choose_tiles(M, tm_max)

    x2 = x.reshape(M, Din)
    m2 = mask.reshape(M, 1).astype(jnp.float32)
    if M_pad != M:
        # Fallback only: padded rows are zeros (NaN-free) and trimmed below.
        x2 = jnp.pad(x2, ((0, M_pad - M), (0, 0)))
        m2 = jnp.pad(m2, ((0, M_pad - M), (0, 0)))

    # Fused parameter tensors, built once (tiny, VMEM-resident in the kernel).
    zeros_w = jnp.zeros((Din, Dout), weight_t.dtype)
    w_pad = jnp.concatenate([weight_t, zeros_w], axis=1)              # (Din, 2*Dout) = [W | 0]
    sel = jnp.concatenate([jnp.zeros((1, Dout), jnp.float32),
                           jnp.ones((1, Dout), jnp.float32)], axis=1)  # (1, 2*Dout) = [0 | 1]
    b_pad = jnp.concatenate([bias.reshape(1, Dout).astype(jnp.float32),
                             jnp.zeros((1, Dout), jnp.float32)], axis=1)  # (1, 2*Dout) = [b | 0]
    nan1 = nan_val.reshape(1).astype(jnp.float32)

    cost = pl.CostEstimate(
        flops=2 * M_pad * (Din + 1) * 2 * Dout,
        transcendentals=0,
        bytes_accessed=4 * (M_pad * (Din + 1 + 2 * Dout) + (Din + 2) * 2 * Dout + 1),
    )

    out = pl.pallas_call(
        nan_embed_kernel,
        out_shape=jax.ShapeDtypeStruct((M_pad, 2 * Dout), jnp.float32),
        grid=(grid_m,),
        in_specs=[
            pl.BlockSpec(memory_space=pltpu.MemorySpace.SMEM),        # nanVal scalar
            pl.BlockSpec((tm, Din), lambda i: (i, 0)),                # x row tile
            pl.BlockSpec((tm, 1), lambda i: (i, 0)),                  # mask row tile
            pl.BlockSpec((Din, 2 * Dout), lambda i: (0, 0)),          # [W | 0]  (resident)
            pl.BlockSpec((1, 2 * Dout), lambda i: (0, 0)),            # [0 | 1]  (resident)
            pl.BlockSpec((1, 2 * Dout), lambda i: (0, 0)),            # [b | 0]  (resident)
        ],
        out_specs=pl.BlockSpec((tm, 2 * Dout), lambda i: (i, 0)),
        compiler_params=pltpu.CompilerParams(
            dimension_semantics=("parallel",),
            # Lane-padded (->128) x/mask/output streams at tm=8192, double
            # buffered, need ~24 MiB; leave headroom but stay under v7x's 64 MiB.
            vmem_limit_bytes=48 * 1024 * 1024,
        ),
        cost_estimate=cost,
    )(nan1, x2, m2, w_pad, sel, b_pad)

    if M_pad != M:
        out = out[:M]
    return out.reshape(B, S, 2 * Dout)


def reference_nan_embed(x, mask, weight_t, bias, nan_val):
    x = jnp.where(jnp.isnan(x), nan_val[0], x)
    emb = jnp.einsum("bsd,de->bse", x, weight_t) + bias
    mask_b = jnp.broadcast_to(mask, emb.shape)
    return jnp.concatenate([emb, mask_b], axis=-1)


if __name__ == "__main__":
    # Small shapes consistent with the module: batch=2, seq_len=8,
    # input_dim=4, output_dim=32.
    B, S, Din, Dout = 2, 8, 4, 32

    key = jax.random.PRNGKey(0)
    kw, kb, kx, km, knan = jax.random.split(key, 5)

    # Deterministic parameter init (mimics nn.Linear's uniform(-1/sqrt(fan_in), ...)).
    bound = 1.0 / math.sqrt(Din)
    weight_t = jax.random.uniform(kw, (Din, Dout), jnp.float32, -bound, bound)
    bias = jax.random.uniform(kb, (Dout,), jnp.float32, -bound, bound)
    nan_val = jnp.array([-1.0], dtype=jnp.float32)   # self.nanVal

    # Inputs: x with some NaNs injected, mask as 0/1 floats with trailing dim 1.
    x = jax.random.normal(kx, (B, S, Din), jnp.float32)
    nan_positions = jax.random.bernoulli(knan, 0.2, (B, S, Din))
    x = jnp.where(nan_positions, jnp.nan, x)
    mask = jax.random.bernoulli(km, 0.5, (B, S, 1)).astype(jnp.float32)

    out = nan_embed(x, mask, weight_t, bias, nan_val)
    out = jax.block_until_ready(out)

    ref = reference_nan_embed(x, mask, weight_t, bias, nan_val)
    assert out.shape == (B, S, 2 * Dout)
    assert jnp.allclose(out, ref, atol=1e-5, rtol=1e-5)

    print("KERNEL_OK")
</pallas_src>

<mosaic_0001>
module attributes {stable_mosaic.version = 11 : i64} {
  func.func @nan_embed_kernel(%arg0: i32, %arg1: memref<1xf32, #tpu.memory_space<smem>>, %arg2: memref<16x4xf32, #tpu.memory_space<vmem>>, %arg3: memref<16x1xf32, #tpu.memory_space<vmem>>, %arg4: memref<4x64xf32, #tpu.memory_space<vmem>>, %arg5: memref<1x64xf32, #tpu.memory_space<vmem>>, %arg6: memref<1x64xf32, #tpu.memory_space<vmem>>, %arg7: memref<16x64xf32, #tpu.memory_space<vmem>>) attributes {dimension_semantics = [#tpu.dimension_semantics<parallel>], iteration_bounds = array<i64: 1>, scalar_prefetch = 0 : i64, scratch_operands = 0 : i64, tpu.core_type = #tpu.core_type<tc>, window_params = [{transform_indices = @transform_0, window_bounds = array<i64: 1>}, {transform_indices = @transform_1, window_bounds = array<i64: 16, 4>}, {transform_indices = @transform_2, window_bounds = array<i64: 16, 1>}, {pipeline_mode = #tpu.pipeline_mode<synchronous>, transform_indices = @transform_3, window_bounds = array<i64: 4, 64>}, {pipeline_mode = #tpu.pipeline_mode<synchronous>, transform_indices = @transform_4, window_bounds = array<i64: 1, 64>}, {pipeline_mode = #tpu.pipeline_mode<synchronous>, transform_indices = @transform_5, window_bounds = array<i64: 1, 64>}, {transform_indices = @transform_6, window_bounds = array<i64: 16, 64>}]} {
    %c0 = arith.constant 0 : index
    %c0_0 = arith.constant 0 : index
    %0 = vector.load %arg2[%c0, %c0_0] : memref<16x4xf32, #tpu.memory_space<vmem>>, vector<16x4xf32>
    %1 = arith.cmpf one, %0, %0 : vector<16x4xf32>
    %c0_1 = arith.constant 0 : index
    %2 = memref.load %arg1[%c0_1] : memref<1xf32, #tpu.memory_space<smem>>
    %3 = vector.broadcast %2 : f32 to vector<16x4xf32>
    %4 = arith.select %1, %3, %0 : vector<16x4xi1>, vector<16x4xf32>
    %c0_2 = arith.constant 0 : index
    %c0_3 = arith.constant 0 : index
    %5 = vector.load %arg4[%c0_2, %c0_3] : memref<4x64xf32, #tpu.memory_space<vmem>>, vector<4x64xf32>
    %cst = arith.constant dense<0.000000e+00> : vector<16x64xf32>
    %6 = tpu.matmul %4, %5, %cst {dimension_numbers = #tpu.dot_dimension_numbers<[1], [0], [0], [1], [0, 0, 1, 1], [], []>} : vector<16x4xf32>, vector<4x64xf32>, vector<16x64xf32> -> vector<16x64xf32>
    %c0_4 = arith.constant 0 : index
    %c0_5 = arith.constant 0 : index
    %7 = vector.load %arg3[%c0_4, %c0_5] : memref<16x1xf32, #tpu.memory_space<vmem>>, vector<16x1xf32>
    %c0_6 = arith.constant 0 : index
    %c0_7 = arith.constant 0 : index
    %8 = vector.load %arg5[%c0_6, %c0_7] : memref<1x64xf32, #tpu.memory_space<vmem>>, vector<1x64xf32>
    %cst_8 = arith.constant dense<0.000000e+00> : vector<16x64xf32>
    %9 = tpu.matmul %7, %8, %cst_8 {dimension_numbers = #tpu.dot_dimension_numbers<[1], [0], [0], [1], [0, 0, 1, 1], [], []>} : vector<16x1xf32>, vector<1x64xf32>, vector<16x64xf32> -> vector<16x64xf32>
    %10 = arith.addf %6, %9 : vector<16x64xf32>
    %c0_9 = arith.constant 0 : index
    %c0_10 = arith.constant 0 : index
    %11 = vector.load %arg6[%c0_9, %c0_10] : memref<1x64xf32, #tpu.memory_space<vmem>>, vector<1x64xf32>
    %12 = vector.broadcast %11 : vector<1x64xf32> to vector<16x64xf32>
    %13 = arith.addf %10, %12 : vector<16x64xf32>
    %c0_11 = arith.constant 0 : index
    %c0_12 = arith.constant 0 : index
    %14 = vector.load %arg7[%c0_11, %c0_12] : memref<16x64xf32, #tpu.memory_space<vmem>>, vector<16x64xf32>
    tpu.vector_store %arg7[%c0_11, %c0_12], %13 {strides = array<i32>} : memref<16x64xf32, #tpu.memory_space<vmem>>, vector<16x64xf32>,
    return
  }
  func.func @transform_0(%arg0: i32) -> i32 {
    %c0_i32 = arith.constant 0 : i32
    %c0_i32_0 = arith.constant 0 : i32
    return %c0_i32 : i32
  }
  func.func @transform_1(%arg0: i32) -> (i32, i32) {
    %c0_i32 = arith.constant 0 : i32
    %c0_i32_0 = arith.constant 0 : i32
    return %arg0, %c0_i32 : i32, i32
  }
  func.func @transform_2(%arg0: i32) -> (i32, i32) {
    %c0_i32 = arith.constant 0 : i32
    %c0_i32_0 = arith.constant 0 : i32
    return %arg0, %c0_i32 : i32, i32
  }
  func.func @transform_3(%arg0: i32) -> (i32, i32) {
    %c0_i32 = arith.constant 0 : i32
    %c0_i32_0 = arith.constant 0 : i32
    %c0_i32_1 = arith.constant 0 : i32
    return %c0_i32, %c0_i32_0 : i32, i32
  }
  func.func @transform_4(%arg0: i32) -> (i32, i32) {
    %c0_i32 = arith.constant 0 : i32
    %c0_i32_0 = arith.constant 0 : i32
    %c0_i32_1 = arith.constant 0 : i32
    return %c0_i32, %c0_i32_0 : i32, i32
  }
  func.func @transform_5(%arg0: i32) -> (i32, i32) {
    %c0_i32 = arith.constant 0 : i32
    %c0_i32_0 = arith.constant 0 : i32
    %c0_i32_1 = arith.constant 0 : i32
    return %c0_i32, %c0_i32_0 : i32, i32
  }
  func.func @transform_6(%arg0: i32) -> (i32, i32) {
    %c0_i32 = arith.constant 0 : i32
    %c0_i32_0 = arith.constant 0 : i32
    return %arg0, %c0_i32 : i32, i32
  }
}

</mosaic_0001>

<bundles_post_ra>
// kernel: tpu_custom_call.1
= control target key start
LH: loop header
LB: loop body
LE: loop exit
PB: predicated region body
PF: predicated region fallthrough
CT: control target
= control target key end

     0   :  { %vm44_vm0 = vcmask 1040384   ;;  %vm37_vm1 = vcmask 7168   ;;  %vm130_vm2 = vcmask 1043456   ;;  %vm123_vm3 = vcmask 31744   ;;  %s363_s0 = inlined_call_operand.<no memory space> [shape: f32[1], index: 0, kind: input, shape index: {}]   ;;  %s364_s1 = inlined_call_operand.vmem [shape: f32[16,4], index: 1, kind: input, shape index: {}]   ;;  %s365_s2 = inlined_call_operand.vmem [shape: f32[16,1], index: 2, kind: input, shape index: {}]   ;;  %s366_s3 = inlined_call_operand.vmem [shape: f32[4,64], index: 3, kind: input, shape index: {}]   ;;  %s367_s4 = inlined_call_operand.vmem [shape: f32[1,64], index: 4, kind: input, shape index: {}]   ;;  %s368_s5 = inlined_call_operand.vmem [shape: f32[1,64], index: 5, kind: input, shape index: {}]   ;;  %s369_s6 = inlined_call_operand.hbm [shape: f32[16,64], index: 6, kind: output, shape index: {}]  }
   0x1   :  { %v36_v0 = vld [vmem:[%s367_s4] sm:$0x1]  ;;  %v30_v2 = vstv %s363_s0  ;;  %v35_v4 = vld [vmem:[%s365_s2 + $0x8] sm:$0xff] }
   0x2   :  { %v34_v1 = vld [vmem:[%s365_s2] sm:$0xff]  ;;  %250 = vmatprep.subr.msk.mxu1 %vm44_vm0, %v36_v0  ;;  %v26_v6 = vld [vmem:[%s364_s1 + $0x8] sm:$0xff] }
   0x3   :  { %252 = vmatprep.mubr.msk.f32.mxu1 %vm37_vm1, %v34_v1  ;;  %v33_v3 = vld [vmem:[%s366_s3] sm:$0xf]  ;;  %251 = vmatpush3.msk.msra.mxu1 %vm44_vm0, %v36_v0 }
   0x4   :  { %v25_v5 = vld [vmem:[%s364_s1] sm:$0xff]  ;;  %255 = vmatprep.subr.msk.mxu0 %vm130_vm2, %v33_v3 }
   0x5   :  { %vm27_vm4 = vcmp.ne.f32.partialorder %v25_v5, %v25_v5 }
   0x6   :  { %12 = vsyncpa [#allocation4], 0  ;;  %253 = vmatmul.mubr.msk.f32.vlgmr.msra.gmra.mrb[0].mxu1 %vm37_vm1, %v35_v4  ;;  %256 = vmatpush3.msk.msra.mxu0 %vm130_vm2, %v33_v3  ;;  %v31_v7 = vsel %vm27_vm4, %v30_v2, %v25_v5  ;;  %vm28_vm5 = vcmp.ne.f32.partialorder %v26_v6, %v26_v6  ;;  %v243_v12 = vld [vmem:[%s368_s5] ss:$0 sm:$0xff]  ;;  %s289_s9 = smov [#allocation3]   ;;  %vm218_vm6 = vcmask 523264  }
   0x7   :  { %257 = vmatprep.mubr.msk.f32.mxu0 %vm123_vm3, %v31_v7  ;;  %v32_v8 = vsel %vm28_vm5, %v30_v2, %v26_v6  ;;  %s226_s10 = sshll.u32 %s289_s9, 4  ;;  %s227_s10 = int_to_ptr.vmem [resolvable:$true] %s226_s10 }
   0x8   :  { %258 = vmatmul.mubr.msk.f32.vlgmr.msra.gmra.mrb[0].mxu0 %vm123_vm3, %v32_v8  ;;  %s265_s1 = scalar_lea.vmem %s227_s10, 256  ;;  %p270_p1 = scmp.lt.s32.totalorder %s227_s10, %s227_s10 }
   0x9   :  { %p266_p0 = scmp.ne.s32.totalorder %s227_s10, %s265_s1  ;;  %p271_p2 = scmp.lt.s32.totalorder %s265_s1, %s265_s1 }
   0xb   :  { %p272_p3 = por %p271_p2, %p270_p1 }
   0xd   :  { %p273_p4 = pnand %p272_p3, %p266_p0 }
  0xd9   :  { %v254_v9 = vpop.f32.mrb[0].mxu1 }
  0xda   :  { %v114_v10 = vpop.f32.mrb[1].mxu1 }
  0xdb   :  { %v259_v11 = vpop.f32.mrb[0].mxu0 }
  0xdc   :  { %v206_v13 = vadd.f32 %v259_v11, %v254_v9  ;;  %v200_v14 = vpop.f32.mrb[1].mxu0 }
  0xdd   :  { %v201_v15 = vadd.f32 %v200_v14, %v114_v10 }
  0xde   :  { %v217_v16 = vadd.f32 %v243_v12, %v206_v13 }
  0xdf   :  { %v216_v17 = vadd.f32 %v243_v12, %v201_v15 }
  0xe0   :  { %220 = vst.msk [vmem:[#allocation3 + $0x8] sm:$0xff] %vm218_vm6, %v217_v16 }
  0xe1   :  { %219 = vst.msk [vmem:[#allocation3] sm:$0xff] %vm218_vm6, %v216_v17 }
  0xe2   :  { %276 = shalt.err (!%p273_p4)
}
  0xe3   :  { %s277_s12 = scalar_lea.hbm %s369_s6, 256 }
  0xe4   :  { %p278_p5 = scmp.ne.s32.totalorder %s369_s6, %s277_s12  ;;  %p281_p6 = scmp.lt.u32.totalorder %s277_s12, %s369_s6 }
  0xe6   :  { %p283_p7 = pnand %p281_p6, %p278_p5 }
  0xe8   :  { %286 = shalt.err (!%p283_p7)
}
  0xe9   :  { %s290_s17 = smov 128   ;;  %s291_s18 = smov 8  }
  0xea   :  { %232 = dma.vmem_to_hbm [thread:$0]  %s227_s10, 256, %s369_s6, [#allocation4], %s290_s17, %s290_s17, %s291_s18  }
  0xeb   :  { %287 = dma.done.wait [#allocation4], 256  }
  0xec   :  { %288 = vsyncadd [#allocation4], 4294967040 }
  0xed   :  { %236 = vsyncpa [#allocation4], 1 }

</bundles_post_ra>
